<compile_context>
chip_gen: v5e
topology: v5e:2x2
jax: 0.10.0
libtpu: 0.0.40
codegen_flags: <defaults>
</compile_context>

<pallas_src>
import jax
import jax.numpy as jnp
from jax import lax
from jax.experimental import pallas as pl
from jax.experimental.pallas import tpu as pltpu

_TB = 8      # batch tile  (multiple of 8 sublanes)
_HP = 128    # hidden dim padded to full lane width (lane-dense output)
_VP = 128    # vocab padded to full lane width (one-hot contraction dim)


def _rnn_kernel(ids_ref, table_ref, whh_ref, out_ref):
    """One batch tile of the Elman recurrence; everything resident in VMEM.

    ids_ref:   (1, L, TB) int32  token ids, time-major within the tile
                                 (-1 marks a padded batch row -> h stays exactly 0)
    table_ref: (VP, HP)   f32    E @ W_ih^T, zero-padded (fused embedding + input proj)
    whh_ref:   (HP, HP)   f32    W_hh^T, zero-padded
    out_ref:   (TB, HP)   f32    final hidden state (lane-dense (8, 128) tile)
    """
    _, L, tb = ids_ref.shape
    vp, hp = table_ref.shape

    ids_t = ids_ref[0]                                               # (L, TB) int32

    # Embedding gather + input projection as ONE hoisted MXU matmul:
    #   one_hot[t, b, v] = (ids[b, t] == v)
    #   xproj[t*TB + b]  = table[ids[b, t]]  (= x_t @ W_ih^T for batch row b, step t)
    iota_v = lax.broadcasted_iota(jnp.int32, (L, tb, vp), 2)
    one_hot = (ids_t[:, :, None] == iota_v).astype(jnp.float32)     # (L, TB, VP)
    xproj = jnp.dot(one_hot.reshape(L * tb, vp), table_ref[...],
                    preferred_element_type=jnp.float32)             # (L*TB, HP)

    whh = whh_ref[...]
    h = jnp.zeros((tb, hp), dtype=jnp.float32)
    # L is small and static; fully unrolled so the LLO scheduler can overlap the EUP
    # tanh of step t with the MXU issue of step t+1.  Only the tiny (TB,HP)@(HP,HP)
    # matmul sits on the serial dependency chain; the xt read is a contiguous,
    # sublane-aligned static slice.
    for t in range(L):
        xt = xproj[t * tb:(t + 1) * tb, :]                           # (TB, HP)
        h = jnp.tanh(xt + jnp.dot(h, whh, preferred_element_type=jnp.float32))
    out_ref[...] = h


def _rnn_last_hidden_padded(ids_tiles, table_pad, whh_pad):
    """ids_tiles: (n_tiles, L, TB) int32 (time-major per tile). Returns (n_tiles*TB, HP)."""
    n_tiles, L, tb = ids_tiles.shape
    vp, hp = table_pad.shape
    return pl.pallas_call(
        _rnn_kernel,
        out_shape=jax.ShapeDtypeStruct((n_tiles * tb, hp), jnp.float32),
        grid=(n_tiles,),
        in_specs=[
            pl.BlockSpec((1, L, tb), lambda b: (b, 0, 0)),   # per-tile token ids
            pl.BlockSpec((vp, hp), lambda b: (0, 0)),        # fused embed+proj table (resident)
            pl.BlockSpec((hp, hp), lambda b: (0, 0)),        # W_hh^T (resident)
        ],
        out_specs=pl.BlockSpec((tb, hp), lambda b: (b, 0)),
        compiler_params=pltpu.CompilerParams(
            dimension_semantics=("parallel",)),               # batch tiles shard across TCs (v7x)
    )(ids_tiles, table_pad, whh_pad)


class TorModelPallas:
    """JAX/Pallas port of TorModel (forward pass only)."""

    def __init__(self, vocab_size, char_dim, char_len, hidden_dim=10, seed=0):
        assert vocab_size <= _VP and hidden_dim <= _HP
        self.char_len = char_len
        self.hidden_dim = hidden_dim

        k_emb, k_ih, k_hh = jax.random.split(jax.random.PRNGKey(seed), 3)
        # Deterministic synthetic parameters with the nn.Module's shapes.
        self.embedding = jax.random.normal(k_emb, (vocab_size, char_dim), jnp.float32)
        bound = 1.0 / jnp.sqrt(hidden_dim)
        self.w_ih = jax.random.uniform(
            k_ih, (hidden_dim, char_dim), jnp.float32, -bound, bound)
        self.w_hh = jax.random.uniform(
            k_hh, (hidden_dim, hidden_dim), jnp.float32, -bound, bound)
        # TODO(synk): self.pool (AvgPool1d) and self.linear (char_dim -> 7) exist in the
        # nn.Module's __init__ but are never used in forward(); intentionally omitted.

        # ---- one-time precompute of kernel parameters -----------------------------
        # Fused embedding + input-projection table  T = E @ W_ih^T  (vocab, H),
        # zero-padded to lane-dense (VP, HP); W_hh^T zero-padded to (HP, HP).
        table = self.embedding @ self.w_ih.T                         # (vocab, H)
        self.table_pad = (jnp.zeros((_VP, _HP), jnp.float32)
                          .at[:vocab_size, :hidden_dim].set(table))
        self.whh_pad = (jnp.zeros((_HP, _HP), jnp.float32)
                        .at[:hidden_dim, :hidden_dim].set(self.w_hh.T))

        h_dim = hidden_dim

        def _infer(x):
            B, L = x.shape
            n_tiles = (B + _TB - 1) // _TB
            b_pad = n_tiles * _TB
            # -1 never matches any vocab id -> padded rows produce exactly-zero hidden
            # state and are sliced off below.
            ids_pad = (jnp.full((b_pad, L), -1, jnp.int32)
                       .at[:B, :].set(x.astype(jnp.int32)))
            # Time-major within each batch tile: kernel's per-step input slice becomes
            # a contiguous, aligned (TB, HP) block.
            ids_tiles = ids_pad.reshape(n_tiles, _TB, L).transpose(0, 2, 1)
            h = _rnn_last_hidden_padded(ids_tiles, self.table_pad, self.whh_pad)
            # Mirrors PyTorch x2.squeeze() (collapses the batch dim when B == 1).
            return jnp.squeeze(h[:B, :h_dim])

        def _loss(x, y):
            # Tail (log_softmax + NLL mean) fused into the same jit region as the kernel.
            y_pred = _infer(x)
            logp = jax.nn.log_softmax(y_pred, axis=-1)
            return -jnp.mean(jnp.take_along_axis(logp, y[:, None], axis=-1))

        self._infer = jax.jit(_infer)
        self._loss = jax.jit(_loss)

    def __call__(self, x, y=None):
        if y is None:
            return self._infer(x)
        return self._loss(x, y)


def _reference_forward(embedding, w_ih, w_hh, x):
    """Pure-JAX reference (embedding lookup + lax.scan RNN) for the correctness check."""
    x1 = jnp.take(embedding, x, axis=0)                              # (B, L, D)

    def step(h, xt):
        return jnp.tanh(xt @ w_ih.T + h @ w_hh.T), None

    h0 = jnp.zeros((x.shape[0], w_hh.shape[0]), jnp.float32)
    h_final, _ = jax.lax.scan(step, h0, jnp.swapaxes(x1, 0, 1))
    return jnp.squeeze(h_final)


if __name__ == "__main__":
    vocab_size = 20   # len(vocab)
    char_dim = 32
    char_len = 8
    batch = 2
    hidden = 10

    model = TorModelPallas(vocab_size, char_dim, char_len, hidden_dim=hidden, seed=0)

    kx, ky = jax.random.split(jax.random.PRNGKey(0))
    x = jax.random.randint(kx, (batch, char_len), 0, vocab_size, dtype=jnp.int32)
    y = jax.random.randint(ky, (batch,), 0, hidden, dtype=jnp.int32)

    # Inference path (y=None)
    y_pred = jax.block_until_ready(model(x))
    assert y_pred.shape == (batch, hidden)

    # Correctness check against the pure-JAX reference.
    ref = jax.block_until_ready(
        _reference_forward(model.embedding, model.w_ih, model.w_hh, x))
    max_err = float(jnp.max(jnp.abs(y_pred - ref)))
    assert jnp.allclose(y_pred, ref, atol=1e-3, rtol=1e-3), f"max abs err {max_err}"

    # Loss path (y provided)
    loss = jax.block_until_ready(model(x, y))
    assert loss.shape == ()
    assert bool(jnp.isfinite(loss))

    print("KERNEL_OK")
</pallas_src>

<mosaic_0001>
module attributes {stable_mosaic.version = 11 : i64} {
  func.func @_rnn_kernel(%arg0: i32, %arg1: memref<1x8x8xi32, #tpu.memory_space<vmem>>, %arg2: memref<128x128xf32, #tpu.memory_space<vmem>>, %arg3: memref<128x128xf32, #tpu.memory_space<vmem>>, %arg4: memref<8x128xf32, #tpu.memory_space<vmem>>) attributes {dimension_semantics = [#tpu.dimension_semantics<parallel>], iteration_bounds = array<i64: 1>, scalar_prefetch = 0 : i64, scratch_operands = 0 : i64, tpu.core_type = #tpu.core_type<tc>, window_params = [{transform_indices = @transform_0, window_bounds = array<i64: 1, 8, 8>}, {pipeline_mode = #tpu.pipeline_mode<synchronous>, transform_indices = @transform_1, window_bounds = array<i64: 128, 128>}, {pipeline_mode = #tpu.pipeline_mode<synchronous>, transform_indices = @transform_2, window_bounds = array<i64: 128, 128>}, {transform_indices = @transform_3, window_bounds = array<i64: 8, 128>}]} {
    %c0 = arith.constant 0 : index
    %c0_0 = arith.constant 0 : index
    %c0_1 = arith.constant 0 : index
    %0 = vector.load %arg1[%c0, %c0_0, %c0_1] : memref<1x8x8xi32, #tpu.memory_space<vmem>>, vector<1x8x8xi32>
    %1 = vector.shape_cast %0 : vector<1x8x8xi32> to vector<8x8xi32>
    %2 = tpu.iota {dimensions = array<i32: 2>} : vector<8x8x128xi32>
    %3 = vector.shape_cast %1 : vector<8x8xi32> to vector<8x8x1xi32>
    %4 = vector.broadcast %3 : vector<8x8x1xi32> to vector<8x8x128xi32>
    %5 = arith.cmpi eq, %4, %2 : vector<8x8x128xi32>
    %6 = arith.extui %5 : vector<8x8x128xi1> to vector<8x8x128xi32>
    %7 = arith.sitofp %6 : vector<8x8x128xi32> to vector<8x8x128xf32>
    %8 = vector.shape_cast %7 : vector<8x8x128xf32> to vector<64x128xf32>
    %c0_2 = arith.constant 0 : index
    %c0_3 = arith.constant 0 : index
    %9 = vector.load %arg2[%c0_2, %c0_3] : memref<128x128xf32, #tpu.memory_space<vmem>>, vector<128x128xf32>
    %cst = arith.constant dense<0.000000e+00> : vector<64x128xf32>
    %10 = tpu.matmul %8, %9, %cst {dimension_numbers = #tpu.dot_dimension_numbers<[1], [0], [0], [1], [0, 0, 1, 1], [], []>} : vector<64x128xf32>, vector<128x128xf32>, vector<64x128xf32> -> vector<64x128xf32>
    %c0_4 = arith.constant 0 : index
    %c0_5 = arith.constant 0 : index
    %11 = vector.load %arg3[%c0_4, %c0_5] : memref<128x128xf32, #tpu.memory_space<vmem>>, vector<128x128xf32>
    %cst_6 = arith.constant 0.000000e+00 : f32
    %12 = vector.broadcast %cst_6 : f32 to vector<8x128xf32>
    %13 = vector.extract_strided_slice %10 {offsets = [0, 0], sizes = [8, 128], strides = [1, 1]} : vector<64x128xf32> to vector<8x128xf32>
    %cst_7 = arith.constant dense<0.000000e+00> : vector<8x128xf32>
    %14 = tpu.matmul %12, %11, %cst_7 {dimension_numbers = #tpu.dot_dimension_numbers<[1], [0], [0], [1], [0, 0, 1, 1], [], []>} : vector<8x128xf32>, vector<128x128xf32>, vector<8x128xf32> -> vector<8x128xf32>
    %15 = arith.addf %13, %14 : vector<8x128xf32>
    %16 = math.tanh %15 : vector<8x128xf32>
    %17 = vector.extract_strided_slice %10 {offsets = [8, 0], sizes = [8, 128], strides = [1, 1]} : vector<64x128xf32> to vector<8x128xf32>
    %cst_8 = arith.constant dense<0.000000e+00> : vector<8x128xf32>
    %18 = tpu.matmul %16, %11, %cst_8 {dimension_numbers = #tpu.dot_dimension_numbers<[1], [0], [0], [1], [0, 0, 1, 1], [], []>} : vector<8x128xf32>, vector<128x128xf32>, vector<8x128xf32> -> vector<8x128xf32>
    %19 = arith.addf %17, %18 : vector<8x128xf32>
    %20 = math.tanh %19 : vector<8x128xf32>
    %21 = vector.extract_strided_slice %10 {offsets = [16, 0], sizes = [8, 128], strides = [1, 1]} : vector<64x128xf32> to vector<8x128xf32>
    %cst_9 = arith.constant dense<0.000000e+00> : vector<8x128xf32>
    %22 = tpu.matmul %20, %11, %cst_9 {dimension_numbers = #tpu.dot_dimension_numbers<[1], [0], [0], [1], [0, 0, 1, 1], [], []>} : vector<8x128xf32>, vector<128x128xf32>, vector<8x128xf32> -> vector<8x128xf32>
    %23 = arith.addf %21, %22 : vector<8x128xf32>
    %24 = math.tanh %23 : vector<8x128xf32>
    %25 = vector.extract_strided_slice %10 {offsets = [24, 0], sizes = [8, 128], strides = [1, 1]} : vector<64x128xf32> to vector<8x128xf32>
    %cst_10 = arith.constant dense<0.000000e+00> : vector<8x128xf32>
    %26 = tpu.matmul %24, %11, %cst_10 {dimension_numbers = #tpu.dot_dimension_numbers<[1], [0], [0], [1], [0, 0, 1, 1], [], []>} : vector<8x128xf32>, vector<128x128xf32>, vector<8x128xf32> -> vector<8x128xf32>
    %27 = arith.addf %25, %26 : vector<8x128xf32>
    %28 = math.tanh %27 : vector<8x128xf32>
    %29 = vector.extract_strided_slice %10 {offsets = [32, 0], sizes = [8, 128], strides = [1, 1]} : vector<64x128xf32> to vector<8x128xf32>
    %cst_11 = arith.constant dense<0.000000e+00> : vector<8x128xf32>
    %30 = tpu.matmul %28, %11, %cst_11 {dimension_numbers = #tpu.dot_dimension_numbers<[1], [0], [0], [1], [0, 0, 1, 1], [], []>} : vector<8x128xf32>, vector<128x128xf32>, vector<8x128xf32> -> vector<8x128xf32>
    %31 = arith.addf %29, %30 : vector<8x128xf32>
    %32 = math.tanh %31 : vector<8x128xf32>
    %33 = vector.extract_strided_slice %10 {offsets = [40, 0], sizes = [8, 128], strides = [1, 1]} : vector<64x128xf32> to vector<8x128xf32>
    %cst_12 = arith.constant dense<0.000000e+00> : vector<8x128xf32>
    %34 = tpu.matmul %32, %11, %cst_12 {dimension_numbers = #tpu.dot_dimension_numbers<[1], [0], [0], [1], [0, 0, 1, 1], [], []>} : vector<8x128xf32>, vector<128x128xf32>, vector<8x128xf32> -> vector<8x128xf32>
    %35 = arith.addf %33, %34 : vector<8x128xf32>
    %36 = math.tanh %35 : vector<8x128xf32>
    %37 = vector.extract_strided_slice %10 {offsets = [48, 0], sizes = [8, 128], strides = [1, 1]} : vector<64x128xf32> to vector<8x128xf32>
    %cst_13 = arith.constant dense<0.000000e+00> : vector<8x128xf32>
    %38 = tpu.matmul %36, %11, %cst_13 {dimension_numbers = #tpu.dot_dimension_numbers<[1], [0], [0], [1], [0, 0, 1, 1], [], []>} : vector<8x128xf32>, vector<128x128xf32>, vector<8x128xf32> -> vector<8x128xf32>
    %39 = arith.addf %37, %38 : vector<8x128xf32>
    %40 = math.tanh %39 : vector<8x128xf32>
    %41 = vector.extract_strided_slice %10 {offsets = [56, 0], sizes = [8, 128], strides = [1, 1]} : vector<64x128xf32> to vector<8x128xf32>
    %cst_14 = arith.constant dense<0.000000e+00> : vector<8x128xf32>
    %42 = tpu.matmul %40, %11, %cst_14 {dimension_numbers = #tpu.dot_dimension_numbers<[1], [0], [0], [1], [0, 0, 1, 1], [], []>} : vector<8x128xf32>, vector<128x128xf32>, vector<8x128xf32> -> vector<8x128xf32>
    %43 = arith.addf %41, %42 : vector<8x128xf32>
    %44 = math.tanh %43 : vector<8x128xf32>
    %c0_15 = arith.constant 0 : index
    %c0_16 = arith.constant 0 : index
    %45 = vector.load %arg4[%c0_15, %c0_16] : memref<8x128xf32, #tpu.memory_space<vmem>>, vector<8x128xf32>
    tpu.vector_store %arg4[%c0_15, %c0_16], %44 {strides = array<i32>} : memref<8x128xf32, #tpu.memory_space<vmem>>, vector<8x128xf32>,
    return
  }
  func.func @transform_0(%arg0: i32) -> (i32, i32, i32) {
    %c0_i32 = arith.constant 0 : i32
    %c0_i32_0 = arith.constant 0 : i32
    %c0_i32_1 = arith.constant 0 : i32
    return %arg0, %c0_i32, %c0_i32_0 : i32, i32, i32
  }
  func.func @transform_1(%arg0: i32) -> (i32, i32) {
    %c0_i32 = arith.constant 0 : i32
    %c0_i32_0 = arith.constant 0 : i32
    %c0_i32_1 = arith.constant 0 : i32
    return %c0_i32, %c0_i32_0 : i32, i32
  }
  func.func @transform_2(%arg0: i32) -> (i32, i32) {
    %c0_i32 = arith.constant 0 : i32
    %c0_i32_0 = arith.constant 0 : i32
    %c0_i32_1 = arith.constant 0 : i32
    return %c0_i32, %c0_i32_0 : i32, i32
  }
  func.func @transform_3(%arg0: i32) -> (i32, i32) {
    %c0_i32 = arith.constant 0 : i32
    %c0_i32_0 = arith.constant 0 : i32
    return %arg0, %c0_i32 : i32, i32
  }
}

</mosaic_0001>

<bundles_post_ra>
// kernel: _infer.1
= control target key start
LH: loop header
LB: loop body
LE: loop exit
PB: predicated region body
PF: predicated region fallthrough
CT: control target
= control target key end

     0   :  { %8 = vsyncpa [#allocation3], 0  ;;  %s698_s0 = inlined_call_operand.vmem [shape: s32[1,8,8], index: 0, kind: input, shape index: {}]   ;;  %s699_s1 = inlined_call_operand.hbm [shape: f32[128,128], index: 1, kind: input, shape index: {}]   ;;  %s700_s2 = inlined_call_operand.hbm [shape: f32[128,128], index: 2, kind: input, shape index: {}]   ;;  %s701_s3 = inlined_call_operand.vmem [shape: f32[8,128], index: 3, kind: output, shape index: {}]  }
   0x1   :  { %s16_s14 = sshll.u32 %s699_s1, 4  ;;  %s17_s14 = int_to_ptr.hbm [resolvable:$true] %s16_s14 }
   0x2   :  { %9 = vsyncpa [#allocation5], 0  ;;  %s478_s15 = smov [#allocation2]   ;;  %s29_s19 = sshll.u32 %s700_s2, 4  ;;  %s30_s19 = int_to_ptr.hbm [resolvable:$true] %s29_s19 }
   0x3   :  { %s18_s16 = sshll.u32 %s478_s15, 4  ;;  %s479_s20 = smov 128   ;;  %s19_s16 = int_to_ptr.vmem [resolvable:$true] %s18_s16 }
   0x4   :  { %s480_s21 = smov 8   ;;  %s481_s22 = smov [#allocation4]  }
   0x5   :  { %24 = dma.hbm_to_vmem [thread:$0]  %s17_s14, 2048, %s19_s16, [#allocation3], %s479_s20, %s479_s20, %s480_s21  }
   0x6   :  { %s31_s23 = sshll.u32 %s481_s22, 4  ;;  %s32_s23 = int_to_ptr.vmem [resolvable:$true] %s31_s23 }
   0x7   :  { %37 = dma.hbm_to_vmem [thread:$0]  %s30_s19, 2048, %s32_s23, [#allocation5], %s479_s20, %s479_s20, %s480_s21  }
   0x8   :  { %474 = dma.done.wait [#allocation3], 2048  }
   0x9   :  { %475 = vsyncadd [#allocation3], 4294965248 }
   0xa   :  { %476 = dma.done.wait [#allocation5], 2048  }
   0xb   :  { %477 = vsyncadd [#allocation5], 4294965248  ;;  %v47_v0 = vlaneseq  ;;  %v514_v2 = vld [vmem:[%s698_s0] sm:$0xff]  ;;  %v144_v3 = vld [vmem:[#allocation2 + $0x78] sm:$0xff]  ;;  %v482_v42 = vmov 0.0   ;;  %v483_v45 = vmov 1.0  }
   0xc   :  { %v516_v4 = vld [vmem:[#allocation4 + $0x78] sm:$0xff]  ;;  %v49_v5 = vperm.slane %v514_v2, 0  ;;  %v63_v6 = vperm.slane %v514_v2, 2  ;;  %145 = vmatpush.msra.mxu0 %v144_v3  ;;  %v143_v7 = vld [vmem:[#allocation2 + $0x70] sm:$0xff]  ;;  %v77_v9 = vperm.slane %v514_v2, 4  ;;  %v142_v10 = vld [vmem:[#allocation2 + $0x68] sm:$0xff] }
   0xd   :  { %v51_v1 = vshrl.u32 %v47_v0, 7  ;;  %202 = vmatpush.msra.mxu1 %v516_v4  ;;  %v521_v8 = vld [vmem:[#allocation4 + $0x70] sm:$0xff]  ;;  %224 = vmatpush.msra.mxu2 %v516_v4  ;;  %v527_v11 = vld [vmem:[#allocation4 + $0x68] sm:$0xff]  ;;  %v141_v12 = vld [vmem:[#allocation2 + $0x60] sm:$0xff]  ;;  %v56_v16 = vperm.slane %v514_v2, 1  ;;  %v70_v17 = vperm.slane %v514_v2, 3 }
   0xe   :  { %246 = vmatpush.msra.mxu3 %v516_v4  ;;  %146 = vmatpush.msra.mxu0 %v143_v7  ;;  %v531_v13 = vld [vmem:[#allocation4 + $0x60] sm:$0xff]  ;;  %v140_v14 = vld [vmem:[#allocation2 + $0x58] sm:$0xff]  ;;  %v139_v18 = vld [vmem:[#allocation2 + $0x50] sm:$0xff]  ;;  %v84_v19 = vperm.slane %v514_v2, 5  ;;  %v91_v26 = vperm.slane %v514_v2, 6  ;;  %v655_v43 = vand.u32 127, %v47_v0 }
   0xf   :  { %407 = vset.pattern.permute.xlu0 %v51_v1  ;;  %408 = vset.pattern.permute.xlu1 %v51_v1  ;;  %v535_v15 = vld [vmem:[#allocation4 + $0x58] sm:$0xff]  ;;  %v545_v20 = vld [vmem:[#allocation4 + $0x50] sm:$0xff]  ;;  %v138_v21 = vld [vmem:[#allocation2 + $0x48] sm:$0xff]  ;;  %v98_v55 = vperm.slane %v514_v2, 7 }
  0x10   :  { %409 = vset.pattern.permute.xlu2 %v51_v1  ;;  %203 = vmatpush.msra.mxu1 %v521_v8  ;;  %v549_v22 = vld [vmem:[#allocation4 + $0x48] sm:$0xff]  ;;  %v137_v23 = vld [vmem:[#allocation2 + $0x40] sm:$0xff]  ;;  %v136_v25 = vld [vmem:[#allocation2 + $0x38] sm:$0xff] }
  0x11   :  { %225 = vmatpush.msra.mxu2 %v521_v8  ;;  %247 = vmatpush.msra.mxu3 %v521_v8  ;;  %v552_v24 = vld [vmem:[#allocation4 + $0x40] sm:$0xff]  ;;  %v558_v27 = vld [vmem:[#allocation4 + $0x38] sm:$0xff]  ;;  %v135_v28 = vld [vmem:[#allocation2 + $0x30] sm:$0xff] }
  0x12   :  { %147 = vmatpush.msra.mxu0 %v142_v10  ;;  %204 = vmatpush.msra.mxu1 %v527_v11  ;;  %v563_v29 = vld [vmem:[#allocation4 + $0x30] sm:$0xff]  ;;  %v134_v30 = vld [vmem:[#allocation2 + $0x28] sm:$0xff]  ;;  %v133_v32 = vld [vmem:[#allocation2 + $0x20] sm:$0xff] }
  0x13   :  { %226 = vmatpush.msra.mxu2 %v527_v11  ;;  %248 = vmatpush.msra.mxu3 %v527_v11  ;;  %v568_v31 = vld [vmem:[#allocation4 + $0x28] sm:$0xff]  ;;  %v572_v33 = vld [vmem:[#allocation4 + $0x20] sm:$0xff]  ;;  %v132_v34 = vld [vmem:[#allocation2 + $0x18] sm:$0xff] }
  0x14   :  { %148 = vmatpush.msra.mxu0 %v141_v12  ;;  %205 = vmatpush.msra.mxu1 %v531_v13  ;;  %v577_v35 = vld [vmem:[#allocation4 + $0x18] sm:$0xff]  ;;  %v131_v36 = vld [vmem:[#allocation2 + $0x10] sm:$0xff]  ;;  %v130_v38 = vld [vmem:[#allocation2 + $0x8] sm:$0xff] }
  0x15   :  { %227 = vmatpush.msra.mxu2 %v531_v13  ;;  %249 = vmatpush.msra.mxu3 %v531_v13  ;;  %v582_v37 = vld [vmem:[#allocation4 + $0x10] sm:$0xff]  ;;  %v587_v39 = vld [vmem:[#allocation4 + $0x8] sm:$0xff]  ;;  %v129_v40 = vld [vmem:[#allocation2] sm:$0xff] }
  0x16   :  { %149 = vmatpush.msra.mxu0 %v140_v14  ;;  %206 = vmatpush.msra.mxu1 %v535_v15  ;;  %v598_v41 = vld [vmem:[#allocation4] sm:$0xff] }
  0x17   :  { %54 = vperm.xlu0 %407, %v49_v5   ;;  %68 = vperm.xlu1 %408, %v63_v6  }
  0x18   :  { %82 = vperm.xlu2 %409, %v77_v9   ;;  %228 = vmatpush.msra.mxu2 %v535_v15 }
  0x19   :  { %150 = vmatpush.msra.mxu0 %v139_v18  ;;  %250 = vmatpush.msra.mxu3 %v535_v15 }
  0x1a   :  { %207 = vmatpush.msra.mxu1 %v545_v20  ;;  %229 = vmatpush.msra.mxu2 %v545_v20 }
  0x1b   :  { %151 = vmatpush.msra.mxu0 %v138_v21  ;;  %251 = vmatpush.msra.mxu3 %v545_v20 }
  0x1c   :  { %208 = vmatpush.msra.mxu1 %v549_v22  ;;  %230 = vmatpush.msra.mxu2 %v549_v22 }
  0x1d   :  { %152 = vmatpush.msra.mxu0 %v137_v23  ;;  %252 = vmatpush.msra.mxu3 %v549_v22 }
  0x1e   :  { %209 = vmatpush.msra.mxu1 %v552_v24  ;;  %231 = vmatpush.msra.mxu2 %v552_v24 }
  0x1f   :  { %61 = vperm.xlu0 %407, %v56_v16   ;;  %75 = vperm.xlu1 %408, %v70_v17  }
  0x20   :  { %89 = vperm.xlu2 %409, %v84_v19   ;;  %153 = vmatpush.msra.mxu0 %v136_v25 }
  0x21   :  { %210 = vmatpush.msra.mxu1 %v558_v27  ;;  %253 = vmatpush.msra.mxu3 %v552_v24 }
  0x22   :  { %154 = vmatpush.msra.mxu0 %v135_v28  ;;  %232 = vmatpush.msra.mxu2 %v558_v27 }
  0x23   :  { %211 = vmatpush.msra.mxu1 %v563_v29  ;;  %254 = vmatpush.msra.mxu3 %v558_v27 }
  0x24   :  { %155 = vmatpush.msra.mxu0 %v134_v30  ;;  %233 = vmatpush.msra.mxu2 %v563_v29 }
  0x25   :  { %212 = vmatpush.msra.mxu1 %v568_v31  ;;  %255 = vmatpush.msra.mxu3 %v563_v29 }
  0x26   :  { %156 = vmatpush.msra.mxu0 %v133_v32  ;;  %234 = vmatpush.msra.mxu2 %v568_v31 }
  0x27   :  { %96 = vperm.xlu0 %407, %v91_v26   ;;  %213 = vmatpush.msra.mxu1 %v572_v33 }
  0x28   :  { %157 = vmatpush.msra.mxu0 %v132_v34  ;;  %256 = vmatpush.msra.mxu3 %v568_v31 }
  0x29   :  { %214 = vmatpush.msra.mxu1 %v577_v35  ;;  %235 = vmatpush.msra.mxu2 %v572_v33 }
  0x2a   :  { %158 = vmatpush.msra.mxu0 %v131_v36  ;;  %257 = vmatpush.msra.mxu3 %v572_v33 }
  0x2b   :  { %215 = vmatpush.msra.mxu1 %v582_v37  ;;  %236 = vmatpush.msra.mxu2 %v577_v35 }
  0x2c   :  { %159 = vmatpush.msra.mxu0 %v130_v38  ;;  %258 = vmatpush.msra.mxu3 %v577_v35 }
  0x2d   :  { %216 = vmatpush.msra.mxu1 %v587_v39  ;;  %237 = vmatpush.msra.mxu2 %v582_v37 }
  0x2e   :  { %259 = vmatpush.msra.mxu3 %v582_v37  ;;  %160 = vmatpush.msra.mxu0 %v129_v40 }
  0x2f   :  { %238 = vmatpush.msra.mxu2 %v587_v39  ;;  %217 = vmatpush.msra.mxu1 %v598_v41 }
  0x30   :  { %260 = vmatpush.msra.mxu3 %v587_v39  ;;  %218 = vmatmul.f32.vlgmr.msra.gmra.mxu1 %v482_v42 }
  0x31   :  { %239 = vmatpush.msra.mxu2 %v598_v41  ;;  %268 = vmatpush.msrb.mxu1 %v516_v4 }
  0x32   :  { %261 = vmatpush.msra.mxu3 %v598_v41  ;;  %334 = vmatpush.msrb.mxu0 %v516_v4 }
  0x33   :  { %290 = vmatpush.msrb.mxu2 %v516_v4  ;;  %269 = vmatpush.msrb.mxu1 %v521_v8 }
  0x34   :  { %312 = vmatpush.msrb.mxu3 %v516_v4  ;;  %335 = vmatpush.msrb.mxu0 %v521_v8 }
  0x35   :  { %291 = vmatpush.msrb.mxu2 %v521_v8  ;;  %270 = vmatpush.msrb.mxu1 %v527_v11 }
  0x36   :  { %313 = vmatpush.msrb.mxu3 %v521_v8  ;;  %336 = vmatpush.msrb.mxu0 %v527_v11 }
  0x37   :  { %292 = vmatpush.msrb.mxu2 %v527_v11  ;;  %271 = vmatpush.msrb.mxu1 %v531_v13 }
  0x38   :  { %314 = vmatpush.msrb.mxu3 %v527_v11  ;;  %337 = vmatpush.msrb.mxu0 %v531_v13 }
  0x39   :  { %293 = vmatpush.msrb.mxu2 %v531_v13  ;;  %272 = vmatpush.msrb.mxu1 %v535_v15 }
  0x3a   :  { %315 = vmatpush.msrb.mxu3 %v531_v13  ;;  %338 = vmatpush.msrb.mxu0 %v535_v15 }
  0x3b   :  { %294 = vmatpush.msrb.mxu2 %v535_v15  ;;  %273 = vmatpush.msrb.mxu1 %v545_v20 }
  0x3c   :  { %316 = vmatpush.msrb.mxu3 %v535_v15  ;;  %339 = vmatpush.msrb.mxu0 %v545_v20 }
  0x3d   :  { %295 = vmatpush.msrb.mxu2 %v545_v20  ;;  %274 = vmatpush.msrb.mxu1 %v549_v22 }
  0x3e   :  { %317 = vmatpush.msrb.mxu3 %v545_v20  ;;  %340 = vmatpush.msrb.mxu0 %v549_v22 }
  0x3f   :  { %296 = vmatpush.msrb.mxu2 %v549_v22  ;;  %275 = vmatpush.msrb.mxu1 %v552_v24 }
  0x40   :  { %318 = vmatpush.msrb.mxu3 %v549_v22  ;;  %341 = vmatpush.msrb.mxu0 %v552_v24 }
  0x41   :  { %297 = vmatpush.msrb.mxu2 %v552_v24  ;;  %276 = vmatpush.msrb.mxu1 %v558_v27 }
  0x42   :  { %319 = vmatpush.msrb.mxu3 %v552_v24  ;;  %342 = vmatpush.msrb.mxu0 %v558_v27 }
  0x43   :  { %298 = vmatpush.msrb.mxu2 %v558_v27  ;;  %277 = vmatpush.msrb.mxu1 %v563_v29 }
  0x44   :  { %320 = vmatpush.msrb.mxu3 %v558_v27  ;;  %343 = vmatpush.msrb.mxu0 %v563_v29 }
  0x45   :  { %299 = vmatpush.msrb.mxu2 %v563_v29  ;;  %278 = vmatpush.msrb.mxu1 %v568_v31 }
  0x46   :  { %321 = vmatpush.msrb.mxu3 %v563_v29  ;;  %344 = vmatpush.msrb.mxu0 %v568_v31 }
  0x47   :  { %300 = vmatpush.msrb.mxu2 %v568_v31  ;;  %279 = vmatpush.msrb.mxu1 %v572_v33 }
  0x48   :  { %322 = vmatpush.msrb.mxu3 %v568_v31  ;;  %345 = vmatpush.msrb.mxu0 %v572_v33 }
  0x49   :  { %301 = vmatpush.msrb.mxu2 %v572_v33  ;;  %280 = vmatpush.msrb.mxu1 %v577_v35 }
  0x4a   :  { %323 = vmatpush.msrb.mxu3 %v572_v33  ;;  %346 = vmatpush.msrb.mxu0 %v577_v35 }
  0x4b   :  { %302 = vmatpush.msrb.mxu2 %v577_v35  ;;  %281 = vmatpush.msrb.mxu1 %v582_v37 }
  0x4c   :  { %324 = vmatpush.msrb.mxu3 %v577_v35  ;;  %347 = vmatpush.msrb.mxu0 %v582_v37 }
  0x4d   :  { %303 = vmatpush.msrb.mxu2 %v582_v37  ;;  %282 = vmatpush.msrb.mxu1 %v587_v39 }
  0x4e   :  { %325 = vmatpush.msrb.mxu3 %v582_v37  ;;  %348 = vmatpush.msrb.mxu0 %v587_v39 }
  0x4f   :  { %304 = vmatpush.msrb.mxu2 %v587_v39  ;;  %283 = vmatpush.msrb.mxu1 %v598_v41 }
  0x50   :  { %326 = vmatpush.msrb.mxu3 %v587_v39  ;;  %349 = vmatpush.msrb.mxu0 %v598_v41 }
  0x51   :  { %305 = vmatpush.msrb.mxu2 %v598_v41  ;;  %356 = vmatpush.msra.mxu1 %v516_v4 }
  0x52   :  { %327 = vmatpush.msrb.mxu3 %v598_v41  ;;  %103 = vperm.xlu1 %408, %v98_v55  }
  0x53   :  { %357 = vmatpush.msra.mxu1 %v521_v8 }
  0x55   :  { %358 = vmatpush.msra.mxu1 %v527_v11 }
  0x57   :  { %359 = vmatpush.msra.mxu1 %v531_v13 }
  0x59   :  { %360 = vmatpush.msra.mxu1 %v535_v15 }
  0x5b   :  { %361 = vmatpush.msra.mxu1 %v545_v20 }
  0x5d   :  { %362 = vmatpush.msra.mxu1 %v549_v22 }
  0x5f   :  { %363 = vmatpush.msra.mxu1 %v552_v24 }
  0x61   :  { %364 = vmatpush.msra.mxu1 %v558_v27 }
  0x63   :  { %365 = vmatpush.msra.mxu1 %v563_v29 }
  0x65   :  { %366 = vmatpush.msra.mxu1 %v568_v31 }
  0x67   :  { %367 = vmatpush.msra.mxu1 %v572_v33 }
  0x69   :  { %368 = vmatpush.msra.mxu1 %v577_v35 }
  0x6b   :  { %369 = vmatpush.msra.mxu1 %v582_v37 }
  0x6d   :  { %370 = vmatpush.msra.mxu1 %v587_v39 }
  0x6f   :  { %371 = vmatpush.msra.mxu1 %v598_v41 }
  0x72   :  { %v83_v49 = vpop.permute.xlu2 %82 }
  0x73   :  { %vm109_vm4 = vcmp.eq.s32.totalorder %v83_v49, %v655_v43 }
  0x7a   :  { %v90_v50 = vpop.permute.xlu2 %89 }
  0x7b   :  { %vm110_vm5 = vcmp.eq.s32.totalorder %v90_v50, %v655_v43 }
  0x89   :  { %v55_v44 = vpop.permute.xlu0 %54  ;;  %v69_v47 = vpop.permute.xlu1 %68 }
  0x8a   :  { %vm105_vm0 = vcmp.eq.s32.totalorder %v55_v44, %v655_v43  ;;  %vm107_vm2 = vcmp.eq.s32.totalorder %v69_v47, %v655_v43 }
  0x8b   :  { %393 = vmatmul.msk.f32.vlgmr.msra.gmra.mxu0 %vm105_vm0, %v483_v45 }
  0x91   :  { %v62_v46 = vpop.permute.xlu0 %61  ;;  %v76_v48 = vpop.permute.xlu1 %75 }
  0x92   :  { %vm106_vm1 = vcmp.eq.s32.totalorder %v62_v46, %v655_v43  ;;  %vm108_vm3 = vcmp.eq.s32.totalorder %v76_v48, %v655_v43 }
  0x93   :  { %394 = vmatmul.msk.f32.gmra.mxu0 %vm106_vm1, %v483_v45 }
  0x99   :  { %v97_v51 = vpop.permute.xlu0 %96 }
  0x9a   :  { %vm111_vm6 = vcmp.eq.s32.totalorder %v97_v51, %v655_v43 }
  0x9b   :  { %395 = vmatmul.msk.f32.gmra.mxu0 %vm107_vm2, %v483_v45 }
  0xa3   :  { %396 = vmatmul.msk.f32.gmra.mxu0 %vm108_vm3, %v483_v45 }
  0xab   :  { %397 = vmatmul.msk.f32.gmra.mxu0 %vm109_vm4, %v483_v45 }
  0xad   :  { %v219_v52 = vpop.f32.mrf.mxu1 }
  0xb3   :  { %398 = vmatmul.msk.f32.gmra.mxu0 %vm110_vm5, %v483_v45 }
  0xbb   :  { %399 = vmatmul.msk.f32.gmra.mxu0 %vm111_vm6, %v483_v45 }
  0xc4   :  { %v104_v57 = vpop.permute.xlu1 %103 }
  0xc5   :  { %vm112_vm7 = vcmp.eq.s32.totalorder %v104_v57, %v655_v43 }
  0xc6   :  { %400 = vmatmul.msk.f32.gmra.mxu0 %vm112_vm7, %v483_v45 }
 0x108   :  { %v162_v53 = vpop.f32.mrf.mxu0 }
 0x109   :  { %v222_v54 = vadd.f32 %v219_v52, %v162_v53 }
 0x10b   :  { %410 = vtanh.f32 %v222_v54 }
 0x110   :  { %v165_v58 = vpop.f32.mrf.mxu0 }
 0x111   :  { %v411_v56 = vpop.eup %410 }
 0x112   :  { %240 = vmatmul.f32.vlgmr.msra.gmra.mxu2 %v411_v56 }
 0x118   :  { %v168_v62 = vpop.f32.mrf.mxu0 }
 0x120   :  { %v171_v2 = vpop.f32.mrf.mxu0 }
 0x128   :  { %v174_v6 = vpop.f32.mrf.mxu0 }
 0x130   :  { %v177_v10 = vpop.f32.mrf.mxu0 }
 0x138   :  { %v180_v14 = vpop.f32.mrf.mxu0 }
 0x143   :  { %v183_v15 = vpop.f32.mrf.mxu0 }
 0x195   :  { %v241_v59 = vpop.f32.mrf.mxu2 }
 0x196   :  { %v244_v60 = vadd.f32 %v241_v59, %v165_v58 }
 0x198   :  { %412 = vtanh.f32 %v244_v60 }
 0x19e   :  { %v413_v61 = vpop.eup %412 }
 0x19f   :  { %262 = vmatmul.f32.vlgmr.msra.gmra.mxu3 %v413_v61 }
 0x222   :  { %v263_v63 = vpop.f32.mrf.mxu3 }
 0x223   :  { %v266_v0 = vadd.f32 %v263_v63, %v168_v62 }
 0x225   :  { %414 = vtanh.f32 %v266_v0 }
 0x22b   :  { %v415_v1 = vpop.eup %414 }
 0x22c   :  { %284 = vmatmul.f32.vlgmr.msrb.gmra.mxu1 %v415_v1 }
 0x2a9   :  { %v285_v3 = vpop.f32.mrf.mxu1 }
 0x2aa   :  { %v288_v4 = vadd.f32 %v285_v3, %v171_v2 }
 0x2ac   :  { %416 = vtanh.f32 %v288_v4 }
 0x2b2   :  { %v417_v5 = vpop.eup %416 }
 0x2b3   :  { %306 = vmatmul.f32.vlgmr.msrb.gmra.mxu2 %v417_v5 }
 0x336   :  { %v307_v7 = vpop.f32.mrf.mxu2 }
 0x337   :  { %v310_v8 = vadd.f32 %v307_v7, %v174_v6 }
 0x339   :  { %418 = vtanh.f32 %v310_v8 }
 0x33f   :  { %v419_v9 = vpop.eup %418 }
 0x340   :  { %328 = vmatmul.f32.vlgmr.msrb.gmra.mxu3 %v419_v9 }
 0x3c3   :  { %v329_v11 = vpop.f32.mrf.mxu3 }
 0x3c4   :  { %v332_v12 = vadd.f32 %v329_v11, %v177_v10 }
 0x3c6   :  { %420 = vtanh.f32 %v332_v12 }
 0x3cc   :  { %v421_v13 = vpop.eup %420 }
 0x3cd   :  { %350 = vmatmul.f32.vlgmr.msrb.gmra.mxu0 %v421_v13 }
 0x44a   :  { %v351_v16 = vpop.f32.mrf.mxu0 }
 0x44b   :  { %v354_v17 = vadd.f32 %v351_v16, %v180_v14 }
 0x44d   :  { %422 = vtanh.f32 %v354_v17 }
 0x453   :  { %v423_v18 = vpop.eup %422 }
 0x454   :  { %372 = vmatmul.f32.vlgmr.msra.gmra.mxu1 %v423_v18 }
 0x4d1   :  { %v373_v19 = vpop.f32.mrf.mxu1 }
 0x4d2   :  { %v376_v20 = vadd.f32 %v373_v19, %v183_v15 }
 0x4d4   :  { %424 = vtanh.f32 %v376_v20 }
 0x4da   :  { %v425_v21 = vpop.eup %424 }
 0x4db   :  { %378 = vst [vmem:[%s701_s3] sm:$0xff] %v425_v21 }
 0x4dc   :  { %383 = vsyncpa [#allocation3], 1 }
 0x4dd   :  { %384 = vsyncpa [#allocation5], 1 }

</bundles_post_ra>
